<compile_context>
chip_gen: v7x
topology: tpu7x:2x2x1
jax: 0.10.0
libtpu: 0.0.40
codegen_flags: <defaults>
</compile_context>

<pallas_src>
import jax
import jax.numpy as jnp
from jax.experimental import pallas as pl
from jax.experimental.pallas import tpu as pltpu


BN_EPS = 1e-5
LEAKY_SLOPE = 0.1


def _round_up(x, m):
    return (x + m - 1) // m * m


# --------------------------------------------------------------------------
# Kernel
# --------------------------------------------------------------------------
def class_block_kernel(x_ref, w1_ref, b1_ref, w2_ref, b2_ref, out_ref, h_ref):
    """Grid = (batch_tile i, classifier_tile j).

    x_ref : (TILE_B, D_pad)      bf16   -- streamed per i
    w1_ref: (D_pad, BOT_pad)     bf16   -- resident (BN folded in)
    b1_ref: (1, BOT_pad)         f32    -- resident (BN folded in)
    w2_ref: (BOT_pad, TILE_N)    bf16   -- streamed per j
    b2_ref: (1, TILE_N)          f32    -- streamed per j
    out_ref:(TILE_B, TILE_N)     f32
    h_ref : (TILE_B, BOT_pad)    bf16   -- VMEM scratch, valid for current i
    """
    j = pl.program_id(1)

    # Recompute the hidden activation only when we start a new batch tile
    # (classifier-N index wrapped back to 0); reuse it for all other j.
    @pl.when(j == 0)
    def _():
        # Linear1 (+ folded BN): bf16 MXU inputs, f32 accumulation.
        h = jnp.dot(x_ref[...], w1_ref[...], preferred_element_type=jnp.float32)
        h = h + b1_ref[...]
        # LeakyReLU(0.1) in f32 on the VPU.
        h = jnp.where(h > 0, h, LEAKY_SLOPE * h)
        # Dropout: identity in inference mode.
        h_ref[...] = h.astype(h_ref.dtype)

    # Classifier Linear: bf16 MXU inputs, f32 accumulation + f32 bias.
    out = jnp.dot(h_ref[...], w2_ref[...], preferred_element_type=jnp.float32)
    out_ref[...] = (out + b2_ref[...]).astype(out_ref.dtype)


# --------------------------------------------------------------------------
# Parameter prep: fold BN into Linear1, pad to lane-dense shapes, cast to bf16
# --------------------------------------------------------------------------
def fold_and_pad_params(params):
    """One-time constant folding + padding. Returns kernel-ready operands."""
    w1 = params["w1"]
    b1 = params["b1"].reshape(-1)
    gamma = params["gamma"].reshape(-1)
    beta = params["beta"].reshape(-1)
    mean = params["running_mean"].reshape(-1)
    var = params["running_var"].reshape(-1)
    w2 = params["w2"]
    b2 = params["b2"].reshape(-1)

    # BN (inference) folded into Linear1:  y = (x@w1 + b1 - mean) * s + beta
    scale = gamma * jax.lax.rsqrt(var + BN_EPS)
    w1f = w1 * scale[None, :]
    b1f = (b1 - mean) * scale + beta

    input_dim, bottleneck = w1.shape
    num_features = w2.shape[1]
    d_pad = _round_up(input_dim, 128)
    bot_pad = _round_up(bottleneck, 128)
    n_pad = _round_up(num_features, 128)

    w1p = jnp.zeros((d_pad, bot_pad), jnp.float32).at[:input_dim, :bottleneck].set(w1f)
    b1p = jnp.zeros((1, bot_pad), jnp.float32).at[0, :bottleneck].set(b1f)
    w2p = jnp.zeros((bot_pad, n_pad), jnp.float32).at[:bottleneck, :num_features].set(w2)
    b2p = jnp.zeros((1, n_pad), jnp.float32).at[0, :num_features].set(b2)

    return dict(
        w1=w1p.astype(jnp.bfloat16),   # MXU operand -> bf16
        b1=b1p,                        # bias / elementwise stays f32
        w2=w2p.astype(jnp.bfloat16),
        b2=b2p,
        input_dim=input_dim,
        num_features=num_features,
    )


# --------------------------------------------------------------------------
# Wrapper
# --------------------------------------------------------------------------
def class_block_forward(x, fused):
    """x: [B, input_dim] float32. fused: output of fold_and_pad_params."""
    B, input_dim = x.shape
    assert input_dim == fused["input_dim"]

    w1, b1, w2, b2 = fused["w1"], fused["b1"], fused["w2"], fused["b2"]
    d_pad, bot_pad = w1.shape
    n_pad = w2.shape[1]
    num_features = fused["num_features"]

    # ---- Tile sizes ----
    # Batch tiles: multiple of 8, up to 256 rows (keeps VMEM bounded on v7x
    # while still big enough to hide the ~0.35us per-grid-step overhead).
    b8 = _round_up(B, 8)
    tile_b = 256 if b8 >= 256 else b8
    b_pad = _round_up(b8, tile_b)
    # Classifier-N tiles: 256 lanes when divisible (full MXU width on
    # v6e/v7x), else 128 (full width on v5e). n_pad is a multiple of 128.
    tile_n = 256 if n_pad % 256 == 0 else 128

    # Pad + bf16-cast the streamed x operand (halves its DMA bytes).
    xp = jnp.zeros((b_pad, d_pad), jnp.bfloat16)
    xp = xp.at[:B, :input_dim].set(x.astype(jnp.bfloat16))

    grid = (b_pad // tile_b, n_pad // tile_n)

    # ---- VMEM budget (double-buffered streamed tiles + resident weights) ----
    streamed = tile_b * d_pad * 2 + tile_b * tile_n * 4 + bot_pad * tile_n * 2 + tile_n * 4
    resident = d_pad * bot_pad * 2 + bot_pad * 4
    scratch = tile_b * bot_pad * 2
    needed = 2 * streamed + 2 * resident + scratch
    vmem_limit = min(max(2 * needed, 32 << 20), 48 << 20)  # safe on v5e/v6e/v7x

    flops = 2 * b_pad * (d_pad + n_pad) * bot_pad
    bytes_accessed = int(xp.size * 2 + w1.size * 2 + w2.size * 2
                         + b1.size * 4 + b2.size * 4 + b_pad * n_pad * 4)

    out_padded = pl.pallas_call(
        class_block_kernel,
        out_shape=jax.ShapeDtypeStruct((b_pad, n_pad), jnp.float32),
        grid_spec=pltpu.PrefetchScalarGridSpec(
            num_scalar_prefetch=0,
            grid=grid,
            in_specs=[
                pl.BlockSpec((tile_b, d_pad), lambda i, j: (i, 0)),   # x
                pl.BlockSpec((d_pad, bot_pad), lambda i, j: (0, 0)),  # w1 (resident)
                pl.BlockSpec((1, bot_pad), lambda i, j: (0, 0)),      # b1 (resident)
                pl.BlockSpec((bot_pad, tile_n), lambda i, j: (0, j)), # w2
                pl.BlockSpec((1, tile_n), lambda i, j: (0, j)),       # b2
            ],
            out_specs=pl.BlockSpec((tile_b, tile_n), lambda i, j: (i, j)),
            scratch_shapes=[pltpu.VMEM((tile_b, bot_pad), jnp.bfloat16)],
        ),
        compiler_params=pltpu.CompilerParams(
            dimension_semantics=("parallel", "arbitrary"),
            vmem_limit_bytes=int(vmem_limit),
        ),
        cost_estimate=pl.CostEstimate(
            flops=flops, transcendentals=0, bytes_accessed=bytes_accessed),
    )(xp, w1, b1, w2, b2)

    return out_padded[:B, :num_features]


# --------------------------------------------------------------------------
# Init mirroring weights_init_kaiming / weights_init_classifier
# --------------------------------------------------------------------------
def init_class_block_params(key, input_dim, num_bottleneck, num_features):
    k1, k2, k3 = jax.random.split(key, 3)

    # Linear1: kaiming_normal_, mode='fan_out' -> std = sqrt(2 / fan_out)
    std1 = (2.0 / num_bottleneck) ** 0.5
    w1 = (std1 * jax.random.normal(k1, (input_dim, num_bottleneck))).astype(jnp.float32)
    b1 = jnp.zeros((1, num_bottleneck), jnp.float32)

    # BatchNorm1d: weight ~ N(1, 0.02), bias = 0, running stats = (0, 1)
    gamma = (1.0 + 0.02 * jax.random.normal(k2, (num_bottleneck,))).reshape(
        1, num_bottleneck).astype(jnp.float32)
    beta = jnp.zeros((1, num_bottleneck), jnp.float32)
    running_mean = jnp.zeros((1, num_bottleneck), jnp.float32)
    running_var = jnp.ones((1, num_bottleneck), jnp.float32)

    # Classifier Linear: normal_(std=0.001), bias = 0
    w2 = (0.001 * jax.random.normal(k3, (num_bottleneck, num_features))).astype(jnp.float32)
    b2 = jnp.zeros((1, num_features), jnp.float32)

    return dict(w1=w1, b1=b1, gamma=gamma, beta=beta,
                running_mean=running_mean, running_var=running_var,
                w2=w2, b2=b2)


def reference_forward(x, p):
    """Pure-JAX f32 reference for the same (inference) forward pass."""
    h = x @ p["w1"] + p["b1"]
    h = (h - p["running_mean"]) * (p["gamma"] * jax.lax.rsqrt(p["running_var"] + BN_EPS)) + p["beta"]
    h = jnp.where(h > 0, h, LEAKY_SLOPE * h)
    return h @ p["w2"] + p["b2"]


if __name__ == "__main__":
    B, INPUT_DIM, NUM_BOTTLENECK, NUM_FEATURES = 8, 32, 128, 16

    key = jax.random.PRNGKey(0)
    kx, kp = jax.random.split(key)
    x = jax.random.normal(kx, (B, INPUT_DIM), dtype=jnp.float32)
    params = init_class_block_params(kp, INPUT_DIM, NUM_BOTTLENECK, NUM_FEATURES)
    fused = fold_and_pad_params(params)

    out = class_block_forward(x, fused)
    out = jax.block_until_ready(out)

    ref = reference_forward(x, params)
    assert out.shape == (B, NUM_FEATURES)
    max_err = float(jnp.max(jnp.abs(out - ref)))
    # bf16 MXU inputs (f32 accumulation) -> loose tolerance vs f32 reference.
    assert jnp.allclose(out, ref, atol=2e-3, rtol=2e-2), f"max abs err {max_err}"

    print("KERNEL_OK")
</pallas_src>

<mosaic_0001>
module attributes {stable_mosaic.version = 11 : i64} {
  func.func @class_block_kernel(%arg0: i32, %arg1: i32, %arg2: memref<8x128xbf16, #tpu.memory_space<vmem>>, %arg3: memref<128x128xbf16, #tpu.memory_space<vmem>>, %arg4: memref<1x128xf32, #tpu.memory_space<vmem>>, %arg5: memref<128x128xbf16, #tpu.memory_space<vmem>>, %arg6: memref<1x128xf32, #tpu.memory_space<vmem>>, %arg7: memref<8x128xf32, #tpu.memory_space<vmem>>, %arg8: memref<8x128xbf16, #tpu.memory_space<vmem>>) attributes {dimension_semantics = [#tpu.dimension_semantics<parallel>, #tpu.dimension_semantics<arbitrary>], iteration_bounds = array<i64: 1, 1>, scalar_prefetch = 0 : i64, scratch_operands = 1 : i64, tpu.core_type = #tpu.core_type<tc>, window_params = [{transform_indices = @transform_0, window_bounds = array<i64: 8, 128>}, {pipeline_mode = #tpu.pipeline_mode<synchronous>, transform_indices = @transform_1, window_bounds = array<i64: 128, 128>}, {pipeline_mode = #tpu.pipeline_mode<synchronous>, transform_indices = @transform_2, window_bounds = array<i64: 1, 128>}, {transform_indices = @transform_3, window_bounds = array<i64: 128, 128>}, {transform_indices = @transform_4, window_bounds = array<i64: 1, 128>}, {transform_indices = @transform_5, window_bounds = array<i64: 8, 128>}]} {
    %c0_i32 = arith.constant 0 : i32
    %0 = arith.cmpi eq, %arg1, %c0_i32 : i32
    %1 = arith.extui %0 : i1 to i32
    %c0_i32_0 = arith.constant 0 : i32
    %2 = arith.cmpi ne, %1, %c0_i32_0 : i32
    scf.if %2 {
      %c0_8 = arith.constant 0 : index
      %c0_9 = arith.constant 0 : index
      %10 = vector.load %arg2[%c0_8, %c0_9] : memref<8x128xbf16, #tpu.memory_space<vmem>>, vector<8x128xbf16>
      %c0_10 = arith.constant 0 : index
      %c0_11 = arith.constant 0 : index
      %11 = vector.load %arg3[%c0_10, %c0_11] : memref<128x128xbf16, #tpu.memory_space<vmem>>, vector<128x128xbf16>
      %cst_12 = arith.constant dense<0.000000e+00> : vector<8x128xf32>
      %12 = tpu.matmul %10, %11, %cst_12 {dimension_numbers = #tpu.dot_dimension_numbers<[1], [0], [0], [1], [0, 0, 1, 1], [], []>} : vector<8x128xbf16>, vector<128x128xbf16>, vector<8x128xf32> -> vector<8x128xf32>
      %c0_13 = arith.constant 0 : index
      %c0_14 = arith.constant 0 : index
      %13 = vector.load %arg4[%c0_13, %c0_14] : memref<1x128xf32, #tpu.memory_space<vmem>>, vector<1x128xf32>
      %14 = vector.broadcast %13 : vector<1x128xf32> to vector<8x128xf32>
      %15 = arith.addf %12, %14 : vector<8x128xf32>
      %cst_15 = arith.constant 0.000000e+00 : f32
      %16 = vector.broadcast %cst_15 : f32 to vector<8x128xf32>
      %17 = arith.cmpf ogt, %15, %16 : vector<8x128xf32>
      %cst_16 = arith.constant 1.000000e-01 : f32
      %18 = vector.broadcast %cst_16 : f32 to vector<8x128xf32>
      %19 = arith.mulf %18, %15 : vector<8x128xf32>
      %20 = arith.select %17, %15, %19 : vector<8x128xi1>, vector<8x128xf32>
      %21 = arith.truncf %20 : vector<8x128xf32> to vector<8x128xbf16>
      %c0_17 = arith.constant 0 : index
      %c0_18 = arith.constant 0 : index
      %22 = vector.load %arg8[%c0_17, %c0_18] : memref<8x128xbf16, #tpu.memory_space<vmem>>, vector<8x128xbf16>
      tpu.vector_store %arg8[%c0_17, %c0_18], %21 {strides = array<i32>} : memref<8x128xbf16, #tpu.memory_space<vmem>>, vector<8x128xbf16>,
    } else {
    }
    %c0 = arith.constant 0 : index
    %c0_1 = arith.constant 0 : index
    %3 = vector.load %arg8[%c0, %c0_1] : memref<8x128xbf16, #tpu.memory_space<vmem>>, vector<8x128xbf16>
    %c0_2 = arith.constant 0 : index
    %c0_3 = arith.constant 0 : index
    %4 = vector.load %arg5[%c0_2, %c0_3] : memref<128x128xbf16, #tpu.memory_space<vmem>>, vector<128x128xbf16>
    %cst = arith.constant dense<0.000000e+00> : vector<8x128xf32>
    %5 = tpu.matmul %3, %4, %cst {dimension_numbers = #tpu.dot_dimension_numbers<[1], [0], [0], [1], [0, 0, 1, 1], [], []>} : vector<8x128xbf16>, vector<128x128xbf16>, vector<8x128xf32> -> vector<8x128xf32>
    %c0_4 = arith.constant 0 : index
    %c0_5 = arith.constant 0 : index
    %6 = vector.load %arg6[%c0_4, %c0_5] : memref<1x128xf32, #tpu.memory_space<vmem>>, vector<1x128xf32>
    %7 = vector.broadcast %6 : vector<1x128xf32> to vector<8x128xf32>
    %8 = arith.addf %5, %7 : vector<8x128xf32>
    %c0_6 = arith.constant 0 : index
    %c0_7 = arith.constant 0 : index
    %9 = vector.load %arg7[%c0_6, %c0_7] : memref<8x128xf32, #tpu.memory_space<vmem>>, vector<8x128xf32>
    tpu.vector_store %arg7[%c0_6, %c0_7], %8 {strides = array<i32>} : memref<8x128xf32, #tpu.memory_space<vmem>>, vector<8x128xf32>,
    return
  }
  func.func @transform_0(%arg0: i32, %arg1: i32) -> (i32, i32) {
    %c0_i32 = arith.constant 0 : i32
    %c0_i32_0 = arith.constant 0 : i32
    return %arg0, %c0_i32 : i32, i32
  }
  func.func @transform_1(%arg0: i32, %arg1: i32) -> (i32, i32) {
    %c0_i32 = arith.constant 0 : i32
    %c0_i32_0 = arith.constant 0 : i32
    %c0_i32_1 = arith.constant 0 : i32
    return %c0_i32, %c0_i32_0 : i32, i32
  }
  func.func @transform_2(%arg0: i32, %arg1: i32) -> (i32, i32) {
    %c0_i32 = arith.constant 0 : i32
    %c0_i32_0 = arith.constant 0 : i32
    %c0_i32_1 = arith.constant 0 : i32
    return %c0_i32, %c0_i32_0 : i32, i32
  }
  func.func @transform_3(%arg0: i32, %arg1: i32) -> (i32, i32) {
    %c0_i32 = arith.constant 0 : i32
    %c0_i32_0 = arith.constant 0 : i32
    return %c0_i32, %arg1 : i32, i32
  }
  func.func @transform_4(%arg0: i32, %arg1: i32) -> (i32, i32) {
    %c0_i32 = arith.constant 0 : i32
    %c0_i32_0 = arith.constant 0 : i32
    return %c0_i32, %arg1 : i32, i32
  }
  func.func @transform_5(%arg0: i32, %arg1: i32) -> (i32, i32) {
    %c0_i32 = arith.constant 0 : i32
    return %arg0, %arg1 : i32, i32
  }
}

</mosaic_0001>

<bundles_post_ra>
// kernel: tpu_custom_call.1
= control target key start
LH: loop header
LB: loop body
LE: loop exit
PB: predicated region body
PF: predicated region fallthrough
CT: control target
= control target key end

     0   :  { %10 = vsyncpa [#allocation4], 0  ;;  %s603_s0 = inlined_call_operand.hbm [shape: bf16[8,128], index: 0, kind: input, shape index: {}]   ;;  %s604_s1 = inlined_call_operand.hbm [shape: bf16[128,128], index: 1, kind: input, shape index: {}]   ;;  %s605_s2 = inlined_call_operand.vmem [shape: f32[1,128], index: 2, kind: input, shape index: {}]   ;;  %s606_s3 = inlined_call_operand.hbm [shape: bf16[128,128], index: 3, kind: input, shape index: {}]   ;;  %s607_s4 = inlined_call_operand.vmem [shape: f32[1,128], index: 4, kind: input, shape index: {}]   ;;  %s608_s5 = inlined_call_operand.hbm [shape: f32[8,128], index: 5, kind: output, shape index: {}]  }
   0x1   :  { %11 = vsyncpa [#allocation7], 0 }
   0x2   :  { %12 = vsyncpa [#allocation5], 0  ;;  %s505_s18 = smov [#allocation6]   ;;  %s411_s22 = scalar_lea.hbm %s604_s1, 1024 }
   0x3   :  { %s28_s19 = sshll.u32 %s505_s18, 4  ;;  %p412_p0 = scmp.ne.s32.totalorder %s604_s1, %s411_s22  ;;  %s29_s19 = int_to_ptr.vmem [resolvable:$true] %s28_s19 }
   0x4   :  { %p415_p1 = scmp.lt.u32.totalorder %s411_s22, %s604_s1 }
   0x6   :  { %p417_p2 = pnand %p415_p1, %p412_p0 }
   0x8   :  { %420 = shalt.err (!%p417_p2)
}
   0x9   :  { %s421_s27 = scalar_lea.vmem %s29_s19, 1024  ;;  %p426_p4 = scmp.lt.s32.totalorder %s29_s19, %s29_s19 }
   0xa   :  { %p422_p3 = scmp.ne.s32.totalorder %s29_s19, %s421_s27  ;;  %p427_p5 = scmp.lt.s32.totalorder %s421_s27, %s421_s27 }
   0xc   :  { %p428_p6 = por %p427_p5, %p426_p4 }
   0xe   :  { %p429_p7 = pnand %p428_p6, %p422_p3 }
  0x10   :  { %432 = shalt.err (!%p429_p7)
}
  0x11   :  { %s506_s28 = smov 64   ;;  %s507_s29 = smov 4  }
  0x12   :  { %34 = dma.hbm_to_vmem [thread:$0]  %s604_s1, 1024, %s29_s19, [#allocation7], %s506_s28, %s506_s28, %s507_s29  }
  0x13   :  { %s508_s7 = smov [#allocation3]   ;;  %s509_s9 = smov [#allocation8]  }
  0x14   :  { %s19_s8 = sshll.u32 %s508_s7, 4  ;;  %s42_s10 = sshll.u32 %s509_s9, 4  ;;  %s20_s8 = int_to_ptr.vmem [resolvable:$true] %s19_s8  ;;  %s43_s10 = int_to_ptr.vmem [resolvable:$true] %s42_s10 }
  0x15   :  { %s433_s13 = scalar_lea.hbm %s603_s0, 64 }
  0x16   :  { %p434_p8 = scmp.ne.s32.totalorder %s603_s0, %s433_s13  ;;  %p437_p9 = scmp.lt.u32.totalorder %s433_s13, %s603_s0 }
  0x18   :  { %p439_p10 = pnand %p437_p9, %p434_p8 }
  0x1a   :  { %442 = shalt.err (!%p439_p10)
}
  0x1b   :  { %s443_s1 = scalar_lea.vmem %s20_s8, 64  ;;  %p448_p12 = scmp.lt.s32.totalorder %s20_s8, %s20_s8 }
  0x1c   :  { %p444_p11 = scmp.ne.s32.totalorder %s20_s8, %s443_s1  ;;  %p449_p13 = scmp.lt.s32.totalorder %s443_s1, %s443_s1 }
  0x1e   :  { %p450_p0 = por %p449_p13, %p448_p12 }
  0x20   :  { %p451_p1 = pnand %p450_p0, %p444_p11 }
  0x22   :  { %454 = shalt.err (!%p451_p1)
}
  0x23   :  { %22 = dma.hbm_to_vmem [thread:$0]  %s603_s0, 64, %s20_s8, [#allocation4]  }
  0x24   :  { %s455_s22 = scalar_lea.hbm %s606_s3, 1024 }
  0x25   :  { %p456_p2 = scmp.ne.s32.totalorder %s606_s3, %s455_s22  ;;  %p459_p3 = scmp.lt.u32.totalorder %s455_s22, %s606_s3 }
  0x27   :  { %p461_p4 = pnand %p459_p3, %p456_p2 }
  0x29   :  { %464 = shalt.err (!%p461_p4)
}
  0x2a   :  { %s465_s27 = scalar_lea.vmem %s43_s10, 1024  ;;  %p470_p6 = scmp.lt.s32.totalorder %s43_s10, %s43_s10 }
  0x2b   :  { %p466_p5 = scmp.ne.s32.totalorder %s43_s10, %s465_s27  ;;  %p471_p7 = scmp.lt.s32.totalorder %s465_s27, %s465_s27 }
  0x2d   :  { %p472_p8 = por %p471_p7, %p470_p6 }
  0x2f   :  { %p473_p9 = pnand %p472_p8, %p466_p5 }
  0x31   :  { %476 = shalt.err (!%p473_p9)
}
  0x32   :  { %48 = dma.hbm_to_vmem [thread:$0]  %s606_s3, 1024, %s43_s10, [#allocation7], %s506_s28, %s506_s28, %s507_s29  }
  0x33   :  { %499 = dma.done.wait [#allocation4], 64  }
  0x34   :  { %500 = vsyncadd [#allocation4], 4294967232 }
  0x35   :  { %501 = dma.done.wait [#allocation7], 2048  }
  0x36   :  { %502 = vsyncadd [#allocation7], 4294965248  ;;  %v510_v0 = vmov 0.0   ;;  %vm511_vm0 = vmmov 0   ;;  %v395_v1 = vld [vmem:[#allocation6] sm:$0xff]   ;;  %v396_v2 = vld [vmem:[#allocation6 + $0x8] sm:$0xff]  }
  0x37   :  { %347 = vmatprep.subr.bf16.mxu0 %v510_v0  ;;  %363 = vmatprep.mubr.msk.bf16.mxu0 %vm511_vm0, %v510_v0  ;;  %v397_v3 = vld [vmem:[#allocation6 + $0x10] sm:$0xff]   ;;  %v403_v4 = vld [vmem:[#allocation8] sm:$0xff]   ;;  %v398_v5 = vld [vmem:[#allocation6 + $0x18] sm:$0xff]   ;;  %s512_s7 = smov [#allocation9]  }
  0x38   :  { %367 = vmatprep.subr.bf16.mxu1 %v510_v0  ;;  %383 = vmatprep.mubr.msk.bf16.mxu1 %vm511_vm0, %v510_v0  ;;  %v404_v6 = vld [vmem:[#allocation8 + $0x8] sm:$0xff]   ;;  %v399_v7 = vld [vmem:[#allocation6 + $0x20] sm:$0xff]   ;;  %v405_v8 = vld [vmem:[#allocation8 + $0x10] sm:$0xff]   ;;  %s301_s8 = sshll.u32 %s512_s7, 4  ;;  %s302_s8 = int_to_ptr.vmem [resolvable:$true] %s301_s8 }
  0x39   :  { %348 = vmatpush3.bf16.msra.mxu0 %v395_v1  ;;  %368 = vmatpush3.bf16.msra.mxu1 %v403_v4  ;;  %v400_v9 = vld [vmem:[#allocation6 + $0x28] sm:$0xff]   ;;  %v406_v10 = vld [vmem:[#allocation8 + $0x18] sm:$0xff]   ;;  %v401_v11 = vld [vmem:[#allocation6 + $0x30] sm:$0xff]   ;;  %p482_p11 = scmp.lt.s32.totalorder %s302_s8, %s302_s8 }
  0x3a   :  { %349 = vmatprep.subr.bf16.mxu0 %v510_v0  ;;  %369 = vmatprep.subr.bf16.mxu1 %v510_v0  ;;  %v402_v12 = vld [vmem:[#allocation6 + $0x38] sm:$0xff]   ;;  %v407_v14 = vld [vmem:[#allocation8 + $0x20] sm:$0xff]   ;;  %v408_v15 = vld [vmem:[#allocation8 + $0x28] sm:$0xff]  }
  0x3b   :  { %v65_v13 = vld [vmem:[#allocation3] sm:$0xf]  ;;  %v409_v16 = vld [vmem:[#allocation8 + $0x30] sm:$0xff]   ;;  %v311_v18 = vld [vmem:[%s605_s2] ss:$0 sm:$0xff]  ;;  %s477_s2 = scalar_lea.vmem %s302_s8, 128 }
  0x3c   :  { %v410_v17 = vld [vmem:[#allocation8 + $0x38] sm:$0xff]   ;;  %p478_p10 = scmp.ne.s32.totalorder %s302_s8, %s477_s2  ;;  %p483_p12 = scmp.lt.s32.totalorder %s477_s2, %s477_s2 }
  0x3d   :  { %350 = vmatpush3.bf16.msra.mxu0 %v396_v2  ;;  %370 = vmatpush3.bf16.msra.mxu1 %v404_v6  ;;  %v320_v28 = vld [vmem:[%s607_s4] ss:$0 sm:$0xff] }
  0x3e   :  { %351 = vmatprep.subr.bf16.mxu0 %v510_v0  ;;  %371 = vmatprep.subr.bf16.mxu1 %v510_v0  ;;  %p484_p13 = por %p483_p12, %p482_p11 }
  0x40   :  { %p485_p0 = pnand %p484_p13, %p478_p10 }
  0x41   :  { %352 = vmatpush3.bf16.msra.mxu0 %v397_v3  ;;  %372 = vmatpush3.bf16.msra.mxu1 %v405_v8 }
  0x42   :  { %353 = vmatprep.subr.bf16.mxu0 %v510_v0  ;;  %373 = vmatprep.subr.bf16.mxu1 %v510_v0 }
  0x45   :  { %354 = vmatpush3.bf16.msra.mxu0 %v398_v5  ;;  %374 = vmatpush3.bf16.msra.mxu1 %v406_v10 }
  0x46   :  { %355 = vmatprep.subr.bf16.mxu0 %v510_v0  ;;  %375 = vmatprep.subr.bf16.mxu1 %v510_v0 }
  0x49   :  { %356 = vmatpush3.bf16.msra.mxu0 %v399_v7  ;;  %376 = vmatpush3.bf16.msra.mxu1 %v407_v14 }
  0x4a   :  { %357 = vmatprep.subr.bf16.mxu0 %v510_v0  ;;  %377 = vmatprep.subr.bf16.mxu1 %v510_v0 }
  0x4d   :  { %358 = vmatpush3.bf16.msra.mxu0 %v400_v9  ;;  %378 = vmatpush3.bf16.msra.mxu1 %v408_v15 }
  0x4e   :  { %359 = vmatprep.subr.bf16.mxu0 %v510_v0  ;;  %379 = vmatprep.subr.bf16.mxu1 %v510_v0 }
  0x51   :  { %360 = vmatpush3.bf16.msra.mxu0 %v401_v11  ;;  %380 = vmatpush3.bf16.msra.mxu1 %v409_v16 }
  0x52   :  { %361 = vmatprep.subr.bf16.mxu0 %v510_v0  ;;  %381 = vmatprep.subr.bf16.mxu1 %v510_v0 }
  0x55   :  { %362 = vmatpush3.bf16.msra.mxu0 %v402_v12  ;;  %382 = vmatpush3.bf16.msra.mxu1 %v410_v17 }
  0x58   :  { %364 = vmatmul.mubr.bf16.vlgmr.msra.gmra.mrb[0].mxu0 %v65_v13 }
 0x12b   :  { %v171_v19 = vpop.f32.mrb[0].mxu0 }
 0x12c   :  { %v172_v20 = vadd.f32 %v311_v18, %v171_v19  ;;  %v365_v21 = vpop.f32.mrb[1].mxu0 }
 0x12d   :  { %v174_v22 = vpop.f32.mrb[2].mxu0 }
 0x12e   :  { %vm177_vm1 = vcmp.gt.f32.partialorder %v172_v20, 0.0  ;;  %v178_v23 = vmul.f32 0.1, %v172_v20  ;;  %v366_v24 = vpop.f32.mrb[3].mxu0 }
 0x130   :  { %v179_v25 = vsel %vm177_vm1, %v172_v20, %v178_v23 }
 0x131   :  { %v180_v26 = vpack.c.bf16 %v179_v25, %v179_v25 }
 0x133   :  { %181 = vst [vmem:[#allocation2] sm:$0xf] %v180_v26 }
 0x13a   :  { %v182_v27 = vld [vmem:[#allocation2] sm:$0xf] }
 0x13b   :  { %384 = vmatmul.mubr.bf16.vlgmr.msra.gmra.mrb[0].mxu1 %v182_v27 }
 0x20e   :  { %v288_v29 = vpop.f32.mrb[0].mxu1 }
 0x20f   :  { %v289_v30 = vadd.f32 %v320_v28, %v288_v29  ;;  %v385_v31 = vpop.f32.mrb[1].mxu1 }
 0x210   :  { %v291_v32 = vpop.f32.mrb[2].mxu1 }
 0x211   :  { %294 = vst [vmem:[#allocation9] sm:$0xff] %v289_v30  ;;  %v386_v33 = vpop.f32.mrb[3].mxu1 }
 0x212   :  { %488 = shalt.err (!%p485_p0)
}
 0x213   :  { %s489_s4 = scalar_lea.hbm %s608_s5, 128 }
 0x214   :  { %p490_p1 = scmp.ne.s32.totalorder %s608_s5, %s489_s4  ;;  %p493_p2 = scmp.lt.u32.totalorder %s489_s4, %s608_s5 }
 0x216   :  { %p495_p3 = pnand %p493_p2, %p490_p1 }
 0x218   :  { %498 = shalt.err (!%p495_p3)
}
 0x219   :  { %304 = dma.vmem_to_hbm [thread:$0]  %s302_s8, 128, %s608_s5, [#allocation5]  }
 0x21a   :  { %503 = dma.done.wait [#allocation5], 128  }
 0x21b   :  { %504 = vsyncadd [#allocation5], 4294967168 }
 0x21c   :  { %308 = vsyncpa [#allocation4], 1 }
 0x21d   :  { %309 = vsyncpa [#allocation7], 1 }
 0x21e   :  { %310 = vsyncpa [#allocation5], 1 }

</bundles_post_ra>
